<compile_context>
chip_gen: v7x
topology: tpu7x:2x2x1
jax: 0.10.0
libtpu: 0.0.40
codegen_flags: <defaults>
</compile_context>

<pallas_src>
import numpy as np
import jax
import jax.numpy as jnp
from jax.experimental import pallas as pl
from jax.experimental.pallas import tpu as pltpu


# ---------------------------------------------------------------------------
# Synthetic "rep" definition (deterministic stand-in for emlp's SumRep).
#   columns  0..15 : scalar / regular irreps       -> self-gated (swish)
#   columns 16..19 : non-regular irrep (dim 4)     -> shared gate scalar @ 24
#   columns 20..23 : non-regular irrep (dim 4)     -> shared gate scalar @ 25
#   rep_size = 24, n_gates = 2, D_TOTAL = 26
# ---------------------------------------------------------------------------
REP_SIZE = 24
N_GATES = 2
D_TOTAL = REP_SIZE + N_GATES
N_SELF_GATED = 16          # columns 0..15 gate themselves (swish)
GATED_IRREP_SPLIT = 20     # columns 16..19 -> gate col 24, 20..23 -> gate col 25


def gate_indices():
    """gate_indices(rep) of the synthetic rep (host-side numpy)."""
    idx = np.arange(REP_SIZE, dtype=np.int32)     # scalar/regular: self-gated
    idx[N_SELF_GATED:GATED_IRREP_SPLIT] = REP_SIZE + 0   # first gated irrep
    idx[GATED_IRREP_SPLIT:REP_SIZE] = REP_SIZE + 1       # second gated irrep
    return idx


# ---------------------------------------------------------------------------
# Pallas kernel
# ---------------------------------------------------------------------------
def gated_nonlin_kernel(values_ref, out_ref):
    v = values_ref[...]                                        # (TB, 26), in-dtype
    vals = v[:, :REP_SIZE]                                     # (TB, 24), in-dtype

    # Gate scalars for the two non-regular irreps (lane-broadcast, VPU/XLU only;
    # no MXU).  sigmoid argument is always f32 for accuracy.
    g0 = v[:, REP_SIZE:REP_SIZE + 1].astype(jnp.float32)       # (TB, 1)
    g1 = v[:, REP_SIZE + 1:REP_SIZE + 2].astype(jnp.float32)   # (TB, 1)

    # Compile-time lane iota -> the two selects lower to constant-mask vsel.
    lane = jax.lax.broadcasted_iota(jnp.int32, (1, REP_SIZE), 1)
    gate = jnp.where(lane < N_SELF_GATED,
                     vals.astype(jnp.float32),                 # self-gated (swish)
                     jnp.where(lane < GATED_IRREP_SPLIT, g0, g1))

    # sigmoid in f32 (EUP slot), multiply in the input dtype (bf16 stays bf16).
    act = jax.nn.sigmoid(gate).astype(v.dtype) * vals
    out_ref[...] = act.astype(out_ref.dtype)


def gated_nonlinearity(values, *, tile_b=8192):
    """values: (..., D_TOTAL) -> (..., REP_SIZE).

    Purely HBM-bound (~104 B in + 96 B out per row for f32), so the batch tile
    must be large enough to amortize the ~0.35 us per-grid-step pipeline
    overhead.  tile_b=8192 rows/step:
      * block buffers (lane-padded to 128, double-buffered, in+out) = 16 MiB,
        which fits the 32 MiB scoped-VMEM limit requested below on all of
        v5e / v6e / v7x (v7x physical VMEM is 64 MiB -> do not raise further
        with this padded layout).
      * ~1.6 MB of useful HBM traffic per step -> per-step overhead < 10%.
    The ragged last block is handled by Pallas (padded reads, masked writeback)
    -- no host-side padding copy in the general case.
    """
    lead_shape = values.shape[:-1]
    d_total = values.shape[-1]
    assert d_total == D_TOTAL, (d_total, D_TOTAL)
    flat = values.reshape(-1, d_total)
    B = flat.shape[0]

    # Degenerate tiny batches (< one sublane group): pad to 8 rows host-side.
    Bp = B
    if B < 8:
        flat = jnp.concatenate(
            [flat, jnp.zeros((8 - B, d_total), flat.dtype)], axis=0)
        Bp = 8

    # Tile: clamp to the batch and round DOWN to a multiple of 8 (second-minor
    # block dim must be divisible by 8); always >= 8.
    tb = max(8, (min(int(tile_b), Bp) // 8) * 8)
    grid = (pl.cdiv(Bp, tb),)

    itemsize = jnp.dtype(values.dtype).itemsize
    cost = pl.CostEstimate(
        flops=3 * Bp * REP_SIZE,                      # selects + multiply
        transcendentals=Bp * REP_SIZE,                # sigmoid
        bytes_accessed=Bp * (D_TOTAL + REP_SIZE) * itemsize,
    )

    out = pl.pallas_call(
        gated_nonlin_kernel,
        out_shape=jax.ShapeDtypeStruct((Bp, REP_SIZE), values.dtype),
        grid_spec=pltpu.PrefetchScalarGridSpec(
            num_scalar_prefetch=0,
            grid=grid,
            in_specs=[pl.BlockSpec((tb, d_total), lambda i: (i, 0))],
            out_specs=pl.BlockSpec((tb, REP_SIZE), lambda i: (i, 0)),
        ),
        compiler_params=pltpu.CompilerParams(
            # "parallel" lets the batch axis shard across both TensorCores on
            # v7x; no-op on single-TC v5e/v6e.
            dimension_semantics=("parallel",),
            # Raise v5e's 16 MiB default so tile_b=8192 fits; this is already
            # the default on v6e/v7x and well under every chip's physical VMEM.
            vmem_limit_bytes=32 * 1024 * 1024,
        ),
        cost_estimate=cost,
    )(flat)

    if Bp != B:
        out = out[:B]
    return out.reshape(*lead_shape, REP_SIZE)


# ---------------------------------------------------------------------------
# Reference (pure JAX), mirrors the PyTorch forward exactly.
# ---------------------------------------------------------------------------
def reference(values, indices):
    gate_scalars = values[..., indices]
    return jax.nn.sigmoid(gate_scalars) * values[..., :REP_SIZE]


if __name__ == "__main__":
    key = jax.random.PRNGKey(0)
    k1, k2, k3, k4, k5 = jax.random.split(key, 5)
    idx = jnp.asarray(gate_indices())

    # Case 1: small deterministic input, B = 2*4 = 8 (multiple of 8).
    x1 = jax.random.normal(k1, (2, 4, D_TOTAL), dtype=jnp.float32)
    o1 = jax.block_until_ready(gated_nonlinearity(x1))
    assert o1.shape == (2, 4, REP_SIZE)
    np.testing.assert_allclose(np.asarray(o1), np.asarray(reference(x1, idx)),
                               rtol=1e-5, atol=1e-5)

    # Case 2: ragged batch (B = 15, not a multiple of 8) -> partial last block.
    x2 = jax.random.normal(k2, (3, 5, D_TOTAL), dtype=jnp.float32)
    o2 = jax.block_until_ready(gated_nonlinearity(x2))
    np.testing.assert_allclose(np.asarray(o2), np.asarray(reference(x2, idx)),
                               rtol=1e-5, atol=1e-5)

    # Case 3: multi-step grid, user tile_b NOT a multiple of 8 (exercises the
    # fixed clamp: 100 -> 96) and a ragged last block (200 = 2*96 + 8).
    x3 = jax.random.normal(k3, (2, 100, D_TOTAL), dtype=jnp.float32)
    o3 = jax.block_until_ready(gated_nonlinearity(x3, tile_b=100))
    np.testing.assert_allclose(np.asarray(o3), np.asarray(reference(x3, idx)),
                               rtol=1e-5, atol=1e-5)

    # Case 4: tiny batch (B = 3 < 8) -> host-side pad-to-8 path.
    x4 = jax.random.normal(k4, (1, 3, D_TOTAL), dtype=jnp.float32)
    o4 = jax.block_until_ready(gated_nonlinearity(x4))
    np.testing.assert_allclose(np.asarray(o4), np.asarray(reference(x4, idx)),
                               rtol=1e-5, atol=1e-5)

    # Case 5: bf16 activations (sigmoid in f32, value path/multiply in bf16).
    x5 = jax.random.normal(k5, (4, 40, D_TOTAL),
                           dtype=jnp.float32).astype(jnp.bfloat16)
    o5 = jax.block_until_ready(gated_nonlinearity(x5))
    ref5 = reference(x5.astype(jnp.float32), idx)
    np.testing.assert_allclose(np.asarray(o5).astype(np.float32),
                               np.asarray(ref5), rtol=5e-2, atol=5e-2)

    print("KERNEL_OK")
</pallas_src>

<mosaic_0001>
module attributes {stable_mosaic.version = 11 : i64} {
  func.func @gated_nonlin_kernel(%arg0: i32, %arg1: memref<8x26xf32, #tpu.memory_space<vmem>>, %arg2: memref<8x24xf32, #tpu.memory_space<vmem>>) attributes {dimension_semantics = [#tpu.dimension_semantics<parallel>], iteration_bounds = array<i64: 1>, scalar_prefetch = 0 : i64, scratch_operands = 0 : i64, tpu.core_type = #tpu.core_type<tc>, window_params = [{transform_indices = @transform_0, window_bounds = array<i64: 8, 26>}, {transform_indices = @transform_1, window_bounds = array<i64: 8, 24>}]} {
    %c0 = arith.constant 0 : index
    %c0_0 = arith.constant 0 : index
    %0 = vector.load %arg1[%c0, %c0_0] : memref<8x26xf32, #tpu.memory_space<vmem>>, vector<8x26xf32>
    %1 = vector.extract_strided_slice %0 {offsets = [0, 0], sizes = [8, 24], strides = [1, 1]} : vector<8x26xf32> to vector<8x24xf32>
    %2 = vector.extract_strided_slice %0 {offsets = [0, 24], sizes = [8, 1], strides = [1, 1]} : vector<8x26xf32> to vector<8x1xf32>
    %3 = vector.extract_strided_slice %0 {offsets = [0, 25], sizes = [8, 1], strides = [1, 1]} : vector<8x26xf32> to vector<8x1xf32>
    %4 = tpu.iota {dimensions = array<i32: 1>} : vector<1x24xi32>
    %c16_i32 = arith.constant 16 : i32
    %5 = vector.broadcast %c16_i32 : i32 to vector<1x24xi32>
    %6 = arith.cmpi slt, %4, %5 : vector<1x24xi32>
    %c20_i32 = arith.constant 20 : i32
    %7 = vector.broadcast %c20_i32 : i32 to vector<1x24xi32>
    %8 = arith.cmpi slt, %4, %7 : vector<1x24xi32>
    %9 = vector.shape_cast %8 : vector<1x24xi1> to vector<1x24xi1>
    %10 = vector.broadcast %9 : vector<1x24xi1> to vector<8x24xi1>
    %11 = vector.shape_cast %2 : vector<8x1xf32> to vector<8x1xf32>
    %12 = vector.broadcast %11 : vector<8x1xf32> to vector<8x24xf32>
    %13 = vector.shape_cast %3 : vector<8x1xf32> to vector<8x1xf32>
    %14 = vector.broadcast %13 : vector<8x1xf32> to vector<8x24xf32>
    %15 = arith.select %10, %12, %14 : vector<8x24xi1>, vector<8x24xf32>
    %16 = vector.shape_cast %6 : vector<1x24xi1> to vector<1x24xi1>
    %17 = vector.broadcast %16 : vector<1x24xi1> to vector<8x24xi1>
    %18 = arith.select %17, %1, %15 : vector<8x24xi1>, vector<8x24xf32>
    %19 = arith.negf %18 : vector<8x24xf32>
    %20 = math.exp %19 : vector<8x24xf32>
    %cst = arith.constant 1.000000e+00 : f32
    %21 = vector.broadcast %cst : f32 to vector<8x24xf32>
    %22 = arith.addf %21, %20 : vector<8x24xf32>
    %23 = arith.divf %21, %22 : vector<8x24xf32>
    %24 = arith.mulf %23, %1 : vector<8x24xf32>
    %c0_1 = arith.constant 0 : index
    %c0_2 = arith.constant 0 : index
    %25 = vector.load %arg2[%c0_1, %c0_2] : memref<8x24xf32, #tpu.memory_space<vmem>>, vector<8x24xf32>
    tpu.vector_store %arg2[%c0_1, %c0_2], %24 {strides = array<i32>} : memref<8x24xf32, #tpu.memory_space<vmem>>, vector<8x24xf32>,
    return
  }
  func.func @transform_0(%arg0: i32) -> (i32, i32) {
    %c0_i32 = arith.constant 0 : i32
    %c0_i32_0 = arith.constant 0 : i32
    return %arg0, %c0_i32 : i32, i32
  }
  func.func @transform_1(%arg0: i32) -> (i32, i32) {
    %c0_i32 = arith.constant 0 : i32
    %c0_i32_0 = arith.constant 0 : i32
    return %arg0, %c0_i32 : i32, i32
  }
}

</mosaic_0001>

<bundles_post_ra>
// kernel: tpu_custom_call.1
= control target key start
LH: loop header
LB: loop body
LE: loop exit
PB: predicated region body
PF: predicated region fallthrough
CT: control target
= control target key end

     0   :  { %6 = vsyncpa [#allocation3], 0  ;;  %s162_s0 = inlined_call_operand.hbm [shape: f32[8,26], index: 0, kind: input, shape index: {}]   ;;  %s163_s1 = inlined_call_operand.hbm [shape: f32[8,24], index: 1, kind: output, shape index: {}]  }
   0x1   :  { %7 = vsyncpa [#allocation4], 0  ;;  %s124_s6 = smov [#allocation2]   ;;  %s76_s10 = scalar_lea.hbm %s162_s0, 128 }
   0x2   :  { %s14_s7 = sshll.u32 %s124_s6, 4  ;;  %p77_p0 = scmp.ne.s32.totalorder %s162_s0, %s76_s10  ;;  %s15_s7 = int_to_ptr.vmem [resolvable:$true] %s14_s7 }
   0x3   :  { %p80_p1 = scmp.lt.u32.totalorder %s76_s10, %s162_s0 }
   0x5   :  { %p82_p2 = pnand %p80_p1, %p77_p0 }
   0x7   :  { %85 = shalt.err (!%p82_p2)
}
   0x8   :  { %s86_s15 = scalar_lea.vmem %s15_s7, 128  ;;  %p91_p4 = scmp.lt.s32.totalorder %s15_s7, %s15_s7 }
   0x9   :  { %p87_p3 = scmp.ne.s32.totalorder %s15_s7, %s86_s15  ;;  %p92_p5 = scmp.lt.s32.totalorder %s86_s15, %s86_s15 }
   0xb   :  { %p93_p6 = por %p92_p5, %p91_p4 }
   0xd   :  { %p94_p7 = pnand %p93_p6, %p87_p3 }
   0xf   :  { %97 = shalt.err (!%p94_p7)
}
  0x10   :  { %17 = dma.hbm_to_vmem [thread:$0]  %s162_s0, 128, %s15_s7, [#allocation3]  }
  0x11   :  { %120 = dma.done.wait [#allocation3], 128  }
  0x12   :  { %121 = vsyncadd [#allocation3], 4294967168  ;;  %v125_v0 = vmov 24   ;;  %v21_v1 = vld [vmem:[#allocation2] sm:$0xff]  ;;  %v126_v2 = vmov 25   ;;  %v22_v3 = vlaneseq  ;;  %s127_s0 = smov [#allocation5]  }
  0x13   :  { %70 = vset.pattern.permute.xlu0 %v125_v0  ;;  %s56_s18 = sshll.u32 %s127_s0, 4  ;;  %vm48_vm2 = vcmask 195584   ;;  %s57_s18 = int_to_ptr.vmem [resolvable:$true] %s56_s18 }
  0x14   :  { %30 = vperm.xlu0 %70, %v21_v1   ;;  %v23_v4 = vand.u32 127, %v22_v3  ;;  %s98_s19 = scalar_lea.vmem %s57_s18, 128  ;;  %p103_p9 = scmp.lt.s32.totalorder %s57_s18, %s57_s18 }
  0x15   :  { %p99_p8 = scmp.ne.s32.totalorder %s57_s18, %s98_s19  ;;  %p104_p10 = scmp.lt.s32.totalorder %s98_s19, %s98_s19 }
  0x16   :  { %vm25_vm0 = vcmp.lt.s32.totalorder %v23_v4, 20  ;;  %vm24_vm1 = vcmp.lt.s32.totalorder %v23_v4, 16 }
  0x17   :  { %p105_p11 = por %p104_p10, %p103_p9 }
  0x18   :  { %71 = vset.pattern.permute.xlu0 %v126_v2 }
  0x19   :  { %34 = vperm.xlu0 %71, %v21_v1   ;;  %p106_p12 = pnand %p105_p11, %p99_p8 }
  0x93   :  { %v31_v5 = vpop.permute.xlu0 %30 }
  0x98   :  { %v35_v6 = vpop.permute.xlu0 %34 }
  0x99   :  { %v37_v7 = vsel %vm25_vm0, %v31_v5, %v35_v6 }
  0x9a   :  { %v40_v8 = vsel %vm24_vm1, %v21_v1, %v37_v7 }
  0x9b   :  { %v65_v9 = vmul.f32 -1.442695, %v40_v8 }
  0x9d   :  { %72 = vpow2.f32 %v65_v9 }
  0xa7   :  { %v73_v10 = vpop.eup %72 }
  0xa8   :  { %v44_v11 = vadd.f32 1.0, %v73_v10 }
  0xaa   :  { %74 = vrcp.f32 %v44_v11 }
  0xb4   :  { %v75_v12 = vpop.eup %74 }
  0xb5   :  { %v47_v13 = vmul.f32 %v75_v12, %v21_v1 }
  0xb7   :  { %49 = vst.msk [vmem:[#allocation5] sm:$0xff] %vm48_vm2, %v47_v13 }
  0xb8   :  { %109 = shalt.err (!%p106_p12)
}
  0xb9   :  { %s110_s22 = scalar_lea.hbm %s163_s1, 128 }
  0xba   :  { %p111_p13 = scmp.ne.s32.totalorder %s163_s1, %s110_s22  ;;  %p114_p0 = scmp.lt.u32.totalorder %s110_s22, %s163_s1 }
  0xbc   :  { %p116_p1 = pnand %p114_p0, %p111_p13 }
  0xbe   :  { %119 = shalt.err (!%p116_p1)
}
  0xbf   :  { %59 = dma.vmem_to_hbm [thread:$0]  %s57_s18, 128, %s163_s1, [#allocation4]  }
  0xc0   :  { %122 = dma.done.wait [#allocation4], 128  }
  0xc1   :  { %123 = vsyncadd [#allocation4], 4294967168 }
  0xc2   :  { %63 = vsyncpa [#allocation3], 1 }
  0xc3   :  { %64 = vsyncpa [#allocation4], 1 }

</bundles_post_ra>
